<compile_context>
chip_gen: v5e
topology: v5e:2x2
jax: 0.10.0
libtpu: 0.0.40
codegen_flags: <defaults>
</compile_context>

<pallas_src>
import functools

import jax
import jax.numpy as jnp
from jax import lax
from jax.experimental import pallas as pl
from jax.experimental.pallas import tpu as pltpu


def _round_up(x, m):
    return ((x + m - 1) // m) * m


def _convbn_kernel(patches_ref, w_ref, gamma_ref, beta_ref, out_ref,
                   sum_ref, sumsq_ref, scale_ref, shift_ref,
                   *, inv_m, eps, neg_slope):
    phase = pl.program_id(0)   # 0 = BN statistics pass, 1 = apply pass
    m_idx = pl.program_id(1)   # M-tile index

    @pl.when((phase == 0) & (m_idx == 0))
    def _init():
        sum_ref[...] = jnp.zeros_like(sum_ref)
        sumsq_ref[...] = jnp.zeros_like(sumsq_ref)

    # Conv tile on the MXU: bf16 x bf16 -> f32 accumulate. Recomputed in both phases
    # (cheaper than spilling the full f32 conv to HBM and re-reading it).
    conv = jnp.dot(patches_ref[...], w_ref[...], preferred_element_type=jnp.float32)

    @pl.when(phase == 0)
    def _stats():
        # Per-channel sum / sum-of-squares accumulated in f32 VMEM scratch.
        # Zero-padded rows contribute 0, so dividing by the *real* M stays exact.
        sum_ref[...] += jnp.sum(conv, axis=0, keepdims=True)
        sumsq_ref[...] += jnp.sum(conv * conv, axis=0, keepdims=True)

    @pl.when((phase == 1) & (m_idx == 0))
    def _finalize_stats():
        mean = sum_ref[...] * inv_m
        var = jnp.maximum(sumsq_ref[...] * inv_m - mean * mean, 0.0)  # biased (train-mode)
        scale = gamma_ref[...] * lax.rsqrt(var + eps)
        scale_ref[...] = scale
        shift_ref[...] = beta_ref[...] - mean * scale

    @pl.when(phase == 1)
    def _apply():
        y = conv * scale_ref[...] + shift_ref[...]
        out_ref[...] = jnp.where(y > 0, y, neg_slope * y).astype(out_ref.dtype)


def _im2col_nhwc(x_nhwc, kh, kw, stride, padding):
    """Extract conv patches. Returns (N*OH*OW, kh*kw*C), OH, OW."""
    if padding > 0:
        x_nhwc = jnp.pad(x_nhwc, ((0, 0), (padding, padding), (padding, padding), (0, 0)))
    n, h, w, c = x_nhwc.shape
    oh = (h - kh) // stride + 1
    ow = (w - kw) // stride + 1
    cols = []
    for i in range(kh):
        for j in range(kw):
            cols.append(x_nhwc[:, i:i + stride * oh:stride, j:j + stride * ow:stride, :])
    # (N, OH, OW, kh*kw, C) -> (N*OH*OW, kh*kw*C); (i, j, c) order matches the
    # weight-matrix reshape in the wrapper.
    patches = jnp.stack(cols, axis=3)
    return patches.reshape(n * oh * ow, kh * kw * c), oh, ow


def conv_bn_leakyrelu(x_nchw, weight_oihw, gamma, beta, *, stride=1, padding=0,
                      eps=1e-5, neg_slope=0.1, block_m=512,
                      compute_dtype=jnp.bfloat16):
    """Forward of ConvBN.  x_nchw: (N, C_in, H, W); returns (N, C_out, OH, OW) f32."""
    n, c_in, _, _ = x_nchw.shape
    c_out, _, kh, kw = weight_oihw.shape

    # NCHW -> NHWC, bf16 operands for the MXU (f32 accumulation in-kernel).
    x_nhwc = jnp.transpose(x_nchw, (0, 2, 3, 1)).astype(compute_dtype)
    patches, oh, ow = _im2col_nhwc(x_nhwc, kh, kw, stride, padding)     # (M, KC) bf16
    m = n * oh * ow
    kc = kh * kw * c_in

    # Lane-dense padding: K and C_out to multiples of 128, M to a multiple of block_m.
    kc_pad = _round_up(kc, 128)
    c_pad = _round_up(c_out, 128)
    block_m = min(block_m, _round_up(m, 16))      # clamp tile to (padded) problem size
    m_pad = _round_up(m, block_m)
    num_m = m_pad // block_m

    patches = jnp.pad(patches, ((0, m_pad - m), (0, kc_pad - kc)))

    # weight (C_out, C_in, KH, KW) -> (KH, KW, C_in, C_out) -> (KC, C_out), zero-padded.
    w_mat = jnp.transpose(weight_oihw, (2, 3, 1, 0)).reshape(kc, c_out)
    w_mat = jnp.pad(w_mat.astype(compute_dtype), ((0, kc_pad - kc), (0, c_pad - c_out)))

    gamma2d = jnp.pad(gamma.reshape(1, c_out).astype(jnp.float32),
                      ((0, 0), (0, c_pad - c_out)))
    beta2d = jnp.pad(beta.reshape(1, c_out).astype(jnp.float32),
                     ((0, 0), (0, c_pad - c_out)))

    kernel = functools.partial(_convbn_kernel, inv_m=1.0 / float(m),
                               eps=float(eps), neg_slope=float(neg_slope))

    itemsize = jnp.dtype(compute_dtype).itemsize
    flops = 2 * (2 * m_pad * kc_pad * c_pad)                       # conv done in both phases
    bytes_accessed = (2 * m_pad * kc_pad * itemsize                # patches read twice
                      + kc_pad * c_pad * itemsize                  # weights (resident)
                      + m_pad * c_pad * 4)                         # f32 output write

    out_flat = pl.pallas_call(
        kernel,
        out_shape=jax.ShapeDtypeStruct((m_pad, c_pad), jnp.float32),
        grid_spec=pltpu.PrefetchScalarGridSpec(
            num_scalar_prefetch=0,
            grid=(2, num_m),                                       # (phase, m-tile)
            in_specs=[
                pl.BlockSpec((block_m, kc_pad), lambda p, i: (i, 0)),   # patches tile
                pl.BlockSpec((kc_pad, c_pad), lambda p, i: (0, 0)),     # weights (resident)
                pl.BlockSpec((1, c_pad), lambda p, i: (0, 0)),          # gamma (resident)
                pl.BlockSpec((1, c_pad), lambda p, i: (0, 0)),          # beta (resident)
            ],
            # During phase 0 the output block index is pinned to 0 (nothing is written),
            # so no garbage writebacks; phase 1 streams the real output tiles.
            out_specs=pl.BlockSpec((block_m, c_pad), lambda p, i: (i * p, 0)),
            scratch_shapes=[
                pltpu.VMEM((1, c_pad), jnp.float32),   # per-channel sum
                pltpu.VMEM((1, c_pad), jnp.float32),   # per-channel sum of squares
                pltpu.VMEM((1, c_pad), jnp.float32),   # fused scale  = gamma * inv_std
                pltpu.VMEM((1, c_pad), jnp.float32),   # fused shift  = beta - mean*scale
            ]),
        compiler_params=pltpu.CompilerParams(
            # Both axes sequential: cross-tile BN reduction + phase ordering.
            dimension_semantics=("arbitrary", "arbitrary"),
            # Explicit limit: tiles are sized well under v7x's 64 MiB physical VMEM.
            vmem_limit_bytes=32 * 1024 * 1024),
        cost_estimate=pl.CostEstimate(flops=flops, transcendentals=0,
                                      bytes_accessed=bytes_accessed),
    )(patches, w_mat, gamma2d, beta2d)

    # Slice off padding: (M_pad, C_pad) -> (N, OH, OW, C_out) -> NCHW.
    out = out_flat[:m, :c_out].reshape(n, oh, ow, c_out)
    return jnp.transpose(out, (0, 3, 1, 2))


def _reference(x_nchw, weight_oihw, gamma, beta, *, stride=1, padding=0,
               eps=1e-5, neg_slope=0.1, operand_dtype=None):
    """Pure-JAX reference. operand_dtype casts conv operands (to mirror bf16 MXU feed)."""
    x = x_nchw.astype(jnp.float32)
    w = weight_oihw.astype(jnp.float32)
    if operand_dtype is not None:
        x = x.astype(operand_dtype).astype(jnp.float32)
        w = w.astype(operand_dtype).astype(jnp.float32)
    conv = lax.conv_general_dilated(
        x, w, window_strides=(stride, stride),
        padding=[(padding, padding), (padding, padding)],
        dimension_numbers=("NCHW", "OIHW", "NCHW"),
        precision=lax.Precision.HIGHEST)
    mean = jnp.mean(conv, axis=(0, 2, 3), keepdims=True)
    var = jnp.mean((conv - mean) ** 2, axis=(0, 2, 3), keepdims=True)
    y = (conv - mean) * lax.rsqrt(var + eps) * gamma.reshape(1, -1, 1, 1) \
        + beta.reshape(1, -1, 1, 1)
    return jnp.where(y > 0, y, neg_slope * y)


if __name__ == "__main__":
    # ConvBN(ch_in=4, ch_out=8, kernel_size=3, stride=1, padding=0)
    ch_in, ch_out, ksize, stride, padding = 4, 8, 3, 1, 0

    key = jax.random.PRNGKey(0)
    kx, kw, kg, kb = jax.random.split(key, 4)

    x = jax.random.normal(kx, (2, ch_in, 16, 16), dtype=jnp.float32)
    weight = 0.1 * jax.random.normal(kw, (ch_out, ch_in, ksize, ksize), dtype=jnp.float32)
    gamma = 1.0 + 0.1 * jax.random.normal(kg, (ch_out,), dtype=jnp.float32)
    beta = 0.1 * jax.random.normal(kb, (ch_out,), dtype=jnp.float32)

    # block_m=128 so the small test exercises multiple M tiles (M = 2*14*14 = 392 -> 4 tiles).
    out = conv_bn_leakyrelu(x, weight, gamma, beta, stride=stride, padding=padding,
                            block_m=128)
    out = jax.block_until_ready(out)
    assert out.shape == (2, ch_out, 14, 14), out.shape

    # Tight check against a reference fed the same bf16-rounded operands (verifies the
    # kernel's matmul / two-phase BN / LeakyReLU logic).
    ref_bf16 = _reference(x, weight, gamma, beta, stride=stride, padding=padding,
                          operand_dtype=jnp.bfloat16)
    err = float(jnp.max(jnp.abs(out - ref_bf16)))
    assert jnp.allclose(out, ref_bf16, atol=1e-3, rtol=1e-3), err

    # Looser sanity check against the full-f32 module semantics (bf16 operand rounding
    # is the only difference).
    ref_f32 = _reference(x, weight, gamma, beta, stride=stride, padding=padding)
    err32 = float(jnp.max(jnp.abs(out - ref_f32)))
    assert jnp.allclose(out, ref_f32, atol=5e-2, rtol=5e-2), err32

    print("KERNEL_OK")
</pallas_src>

<mosaic_0001>
module attributes {stable_mosaic.version = 11 : i64} {
  func.func @_convbn_kernel(%arg0: i32, %arg1: i32, %arg2: memref<128x128xbf16, #tpu.memory_space<vmem>>, %arg3: memref<128x128xbf16, #tpu.memory_space<vmem>>, %arg4: memref<1x128xf32, #tpu.memory_space<vmem>>, %arg5: memref<1x128xf32, #tpu.memory_space<vmem>>, %arg6: memref<128x128xf32, #tpu.memory_space<vmem>>, %arg7: memref<1x128xf32, #tpu.memory_space<vmem>>, %arg8: memref<1x128xf32, #tpu.memory_space<vmem>>, %arg9: memref<1x128xf32, #tpu.memory_space<vmem>>, %arg10: memref<1x128xf32, #tpu.memory_space<vmem>>) attributes {dimension_semantics = [#tpu.dimension_semantics<arbitrary>, #tpu.dimension_semantics<arbitrary>], iteration_bounds = array<i64: 2, 4>, scalar_prefetch = 0 : i64, scratch_operands = 4 : i64, tpu.core_type = #tpu.core_type<tc>, window_params = [{transform_indices = @transform_0, window_bounds = array<i64: 128, 128>}, {pipeline_mode = #tpu.pipeline_mode<synchronous>, transform_indices = @transform_1, window_bounds = array<i64: 128, 128>}, {pipeline_mode = #tpu.pipeline_mode<synchronous>, transform_indices = @transform_2, window_bounds = array<i64: 1, 128>}, {pipeline_mode = #tpu.pipeline_mode<synchronous>, transform_indices = @transform_3, window_bounds = array<i64: 1, 128>}, {transform_indices = @transform_4, window_bounds = array<i64: 128, 128>}]} {
    %c0_i32 = arith.constant 0 : i32
    %0 = arith.cmpi eq, %arg0, %c0_i32 : i32
    %c0_i32_0 = arith.constant 0 : i32
    %1 = arith.cmpi eq, %arg1, %c0_i32_0 : i32
    %2 = arith.andi %0, %1 : i1
    %3 = arith.extui %2 : i1 to i32
    %c0_i32_1 = arith.constant 0 : i32
    %4 = arith.cmpi ne, %3, %c0_i32_1 : i32
    scf.if %4 {
      %cst_11 = arith.constant 0.000000e+00 : f32
      %19 = vector.broadcast %cst_11 : f32 to vector<1x128xf32>
      %c0_12 = arith.constant 0 : index
      %c0_13 = arith.constant 0 : index
      %20 = vector.load %arg7[%c0_12, %c0_13] : memref<1x128xf32, #tpu.memory_space<vmem>>, vector<1x128xf32>
      tpu.vector_store %arg7[%c0_12, %c0_13], %19 {strides = array<i32>} : memref<1x128xf32, #tpu.memory_space<vmem>>, vector<1x128xf32>,
      %cst_14 = arith.constant 0.000000e+00 : f32
      %21 = vector.broadcast %cst_14 : f32 to vector<1x128xf32>
      %c0_15 = arith.constant 0 : index
      %c0_16 = arith.constant 0 : index
      %22 = vector.load %arg8[%c0_15, %c0_16] : memref<1x128xf32, #tpu.memory_space<vmem>>, vector<1x128xf32>
      tpu.vector_store %arg8[%c0_15, %c0_16], %21 {strides = array<i32>} : memref<1x128xf32, #tpu.memory_space<vmem>>, vector<1x128xf32>,
    } else {
    }
    %c0 = arith.constant 0 : index
    %c0_2 = arith.constant 0 : index
    %5 = vector.load %arg2[%c0, %c0_2] : memref<128x128xbf16, #tpu.memory_space<vmem>>, vector<128x128xbf16>
    %c0_3 = arith.constant 0 : index
    %c0_4 = arith.constant 0 : index
    %6 = vector.load %arg3[%c0_3, %c0_4] : memref<128x128xbf16, #tpu.memory_space<vmem>>, vector<128x128xbf16>
    %cst = arith.constant dense<0.000000e+00> : vector<128x128xf32>
    %7 = tpu.matmul %5, %6, %cst {dimension_numbers = #tpu.dot_dimension_numbers<[1], [0], [0], [1], [0, 0, 1, 1], [], []>} : vector<128x128xbf16>, vector<128x128xbf16>, vector<128x128xf32> -> vector<128x128xf32>
    %c0_i32_5 = arith.constant 0 : i32
    %8 = arith.cmpi eq, %arg0, %c0_i32_5 : i32
    %9 = arith.extui %8 : i1 to i32
    %c0_i32_6 = arith.constant 0 : i32
    %10 = arith.cmpi ne, %9, %c0_i32_6 : i32
    scf.if %10 {
      %c0_11 = arith.constant 0 : index
      %c0_12 = arith.constant 0 : index
      %19 = vector.load %arg7[%c0_11, %c0_12] : memref<1x128xf32, #tpu.memory_space<vmem>>, vector<1x128xf32>
      %cst_13 = arith.constant dense<0.000000e+00> : vector<128xf32>
      %20 = vector.multi_reduction <add>, %7, %cst_13 [0] : vector<128x128xf32> to vector<128xf32>
      %21 = vector.shape_cast %20 : vector<128xf32> to vector<1x128xf32>
      %22 = arith.addf %19, %21 : vector<1x128xf32>
      %c0_14 = arith.constant 0 : index
      %c0_15 = arith.constant 0 : index
      %23 = vector.load %arg7[%c0_14, %c0_15] : memref<1x128xf32, #tpu.memory_space<vmem>>, vector<1x128xf32>
      tpu.vector_store %arg7[%c0_14, %c0_15], %22 {strides = array<i32>} : memref<1x128xf32, #tpu.memory_space<vmem>>, vector<1x128xf32>,
      %c0_16 = arith.constant 0 : index
      %c0_17 = arith.constant 0 : index
      %24 = vector.load %arg8[%c0_16, %c0_17] : memref<1x128xf32, #tpu.memory_space<vmem>>, vector<1x128xf32>
      %25 = arith.mulf %7, %7 : vector<128x128xf32>
      %cst_18 = arith.constant dense<0.000000e+00> : vector<128xf32>
      %26 = vector.multi_reduction <add>, %25, %cst_18 [0] : vector<128x128xf32> to vector<128xf32>
      %27 = vector.shape_cast %26 : vector<128xf32> to vector<1x128xf32>
      %28 = arith.addf %24, %27 : vector<1x128xf32>
      %c0_19 = arith.constant 0 : index
      %c0_20 = arith.constant 0 : index
      %29 = vector.load %arg8[%c0_19, %c0_20] : memref<1x128xf32, #tpu.memory_space<vmem>>, vector<1x128xf32>
      tpu.vector_store %arg8[%c0_19, %c0_20], %28 {strides = array<i32>} : memref<1x128xf32, #tpu.memory_space<vmem>>, vector<1x128xf32>,
    } else {
    }
    %c1_i32 = arith.constant 1 : i32
    %11 = arith.cmpi eq, %arg0, %c1_i32 : i32
    %c0_i32_7 = arith.constant 0 : i32
    %12 = arith.cmpi eq, %arg1, %c0_i32_7 : i32
    %13 = arith.andi %11, %12 : i1
    %14 = arith.extui %13 : i1 to i32
    %c0_i32_8 = arith.constant 0 : i32
    %15 = arith.cmpi ne, %14, %c0_i32_8 : i32
    scf.if %15 {
      %c0_11 = arith.constant 0 : index
      %c0_12 = arith.constant 0 : index
      %19 = vector.load %arg7[%c0_11, %c0_12] : memref<1x128xf32, #tpu.memory_space<vmem>>, vector<1x128xf32>
      %cst_13 = arith.constant 0.00255102036 : f32
      %20 = vector.broadcast %cst_13 : f32 to vector<1x128xf32>
      %21 = arith.mulf %19, %20 : vector<1x128xf32>
      %c0_14 = arith.constant 0 : index
      %c0_15 = arith.constant 0 : index
      %22 = vector.load %arg8[%c0_14, %c0_15] : memref<1x128xf32, #tpu.memory_space<vmem>>, vector<1x128xf32>
      %cst_16 = arith.constant 0.00255102036 : f32
      %23 = vector.broadcast %cst_16 : f32 to vector<1x128xf32>
      %24 = arith.mulf %22, %23 : vector<1x128xf32>
      %25 = arith.mulf %21, %21 : vector<1x128xf32>
      %26 = arith.subf %24, %25 : vector<1x128xf32>
      %cst_17 = arith.constant 0.000000e+00 : f32
      %27 = vector.broadcast %cst_17 : f32 to vector<1x128xf32>
      %28 = arith.maximumf %26, %27 : vector<1x128xf32>
      %c0_18 = arith.constant 0 : index
      %c0_19 = arith.constant 0 : index
      %29 = vector.load %arg4[%c0_18, %c0_19] : memref<1x128xf32, #tpu.memory_space<vmem>>, vector<1x128xf32>
      %cst_20 = arith.constant 9.99999974E-6 : f32
      %30 = vector.broadcast %cst_20 : f32 to vector<1x128xf32>
      %31 = arith.addf %28, %30 : vector<1x128xf32>
      %32 = math.rsqrt %31 : vector<1x128xf32>
      %33 = arith.mulf %29, %32 : vector<1x128xf32>
      %c0_21 = arith.constant 0 : index
      %c0_22 = arith.constant 0 : index
      %34 = vector.load %arg9[%c0_21, %c0_22] : memref<1x128xf32, #tpu.memory_space<vmem>>, vector<1x128xf32>
      tpu.vector_store %arg9[%c0_21, %c0_22], %33 {strides = array<i32>} : memref<1x128xf32, #tpu.memory_space<vmem>>, vector<1x128xf32>,
      %c0_23 = arith.constant 0 : index
      %c0_24 = arith.constant 0 : index
      %35 = vector.load %arg5[%c0_23, %c0_24] : memref<1x128xf32, #tpu.memory_space<vmem>>, vector<1x128xf32>
      %36 = arith.mulf %21, %33 : vector<1x128xf32>
      %37 = arith.subf %35, %36 : vector<1x128xf32>
      %c0_25 = arith.constant 0 : index
      %c0_26 = arith.constant 0 : index
      %38 = vector.load %arg10[%c0_25, %c0_26] : memref<1x128xf32, #tpu.memory_space<vmem>>, vector<1x128xf32>
      tpu.vector_store %arg10[%c0_25, %c0_26], %37 {strides = array<i32>} : memref<1x128xf32, #tpu.memory_space<vmem>>, vector<1x128xf32>,
    } else {
    }
    %c1_i32_9 = arith.constant 1 : i32
    %16 = arith.cmpi eq, %arg0, %c1_i32_9 : i32
    %17 = arith.extui %16 : i1 to i32
    %c0_i32_10 = arith.constant 0 : i32
    %18 = arith.cmpi ne, %17, %c0_i32_10 : i32
    scf.if %18 {
      %c0_11 = arith.constant 0 : index
      %c0_12 = arith.constant 0 : index
      %19 = vector.load %arg9[%c0_11, %c0_12] : memref<1x128xf32, #tpu.memory_space<vmem>>, vector<1x128xf32>
      %20 = vector.broadcast %19 : vector<1x128xf32> to vector<128x128xf32>
      %21 = arith.mulf %7, %20 : vector<128x128xf32>
      %c0_13 = arith.constant 0 : index
      %c0_14 = arith.constant 0 : index
      %22 = vector.load %arg10[%c0_13, %c0_14] : memref<1x128xf32, #tpu.memory_space<vmem>>, vector<1x128xf32>
      %23 = vector.broadcast %22 : vector<1x128xf32> to vector<128x128xf32>
      %24 = arith.addf %21, %23 : vector<128x128xf32>
      %cst_15 = arith.constant 0.000000e+00 : f32
      %25 = vector.broadcast %cst_15 : f32 to vector<128x128xf32>
      %26 = arith.cmpf ogt, %24, %25 : vector<128x128xf32>
      %cst_16 = arith.constant 1.000000e-01 : f32
      %27 = vector.broadcast %cst_16 : f32 to vector<128x128xf32>
      %28 = arith.mulf %27, %24 : vector<128x128xf32>
      %29 = arith.select %26, %24, %28 : vector<128x128xi1>, vector<128x128xf32>
      %c0_17 = arith.constant 0 : index
      %c0_18 = arith.constant 0 : index
      %30 = vector.load %arg6[%c0_17, %c0_18] : memref<128x128xf32, #tpu.memory_space<vmem>>, vector<128x128xf32>
      tpu.vector_store %arg6[%c0_17, %c0_18], %29 {strides = array<i32>} : memref<128x128xf32, #tpu.memory_space<vmem>>, vector<128x128xf32>,
    } else {
    }
    return
  }
  func.func @transform_0(%arg0: i32, %arg1: i32) -> (i32, i32) {
    %c0_i32 = arith.constant 0 : i32
    %c0_i32_0 = arith.constant 0 : i32
    return %arg1, %c0_i32 : i32, i32
  }
  func.func @transform_1(%arg0: i32, %arg1: i32) -> (i32, i32) {
    %c0_i32 = arith.constant 0 : i32
    %c0_i32_0 = arith.constant 0 : i32
    %c0_i32_1 = arith.constant 0 : i32
    return %c0_i32, %c0_i32_0 : i32, i32
  }
  func.func @transform_2(%arg0: i32, %arg1: i32) -> (i32, i32) {
    %c0_i32 = arith.constant 0 : i32
    %c0_i32_0 = arith.constant 0 : i32
    %c0_i32_1 = arith.constant 0 : i32
    return %c0_i32, %c0_i32_0 : i32, i32
  }
  func.func @transform_3(%arg0: i32, %arg1: i32) -> (i32, i32) {
    %c0_i32 = arith.constant 0 : i32
    %c0_i32_0 = arith.constant 0 : i32
    %c0_i32_1 = arith.constant 0 : i32
    return %c0_i32, %c0_i32_0 : i32, i32
  }
  func.func @transform_4(%arg0: i32, %arg1: i32) -> (i32, i32) {
    %0 = arith.muli %arg1, %arg0 : i32
    %c0_i32 = arith.constant 0 : i32
    %c0_i32_0 = arith.constant 0 : i32
    return %0, %c0_i32 : i32, i32
  }
}

</mosaic_0001>

<bundles_post_ra>
// kernel: tpu_custom_call.1
= control target key start
LH: loop header
LB: loop body
LE: loop exit
PB: predicated region body
PF: predicated region fallthrough
CT: control target
= control target key end

     0   :  { %s1595_s0 = inlined_call_operand.hbm [shape: bf16[512,128], index: 0, kind: input, shape index: {}]   ;;  %s1596_s1 = inlined_call_operand.hbm [shape: bf16[128,128], index: 1, kind: input, shape index: {}]   ;;  %s1597_s2 = inlined_call_operand.vmem [shape: f32[1,128], index: 2, kind: input, shape index: {}]   ;;  %s1598_s3 = inlined_call_operand.vmem [shape: f32[1,128], index: 3, kind: input, shape index: {}]   ;;  %s1599_s4 = inlined_call_operand.hbm [shape: f32[512,128], index: 4, kind: output, shape index: {}]  }
   0x1   :  { %1610 = sst [smem:[#allocation21_spill]] %s1596_s1 }
   0x2   :  { %1611 = sst [smem:[#allocation22_spill]] %s1597_s2 }
   0x3   :  { %1612 = sst [smem:[#allocation23_spill]] %s1598_s3 }
   0x4   :  { %1613 = sst [smem:[#allocation24_spill]] %s1599_s4 }
   0x5   :  { %9 = vsyncpa [#allocation7], 0 }
   0x6   :  { %11 = vsyncpa [#allocation7 + $0x1], 0 }
   0x7   :  { %12 = vsyncpa [#allocation10], 0 }
   0x8   :  { %13 = vsyncpa [#allocation8], 0 }
   0x9   :  { %15 = vsyncpa [#allocation8 + $0x1], 0  ;;  %s1218_s15 = smov 0   ;;  %s1220_s16 = smov 0  }
   0xa   :  { %s1222_s17 = smov 0   ;;  %s1224_s18 = smov 0  }
   0xb   :  { %s1226_s19 = smov 0   ;;  %s1228_s20 = smov 0  }
   0xc   :  { %s1230_s21 = smov 0   ;;  %s1232_s22 = smov 0  }
   0xd   :  { %s1234_s23 = smov 0   ;;  %s1236_s24 = smov 0  }
   0xe   :  { %s1238_s25 = smov 0  }
   0xf LB: > { %1614 = sst [smem:[#allocation15_spill]] %s1145_s15  ;;  %s752_s26 = sadd.s32 4294967295, %s1185_s25   ;;  %s1185_s25 = sphi %s1238_s25, %s21_s25   ;;  %s1181_s24 = sphi %s1236_s24, %s1637_s24   ;;  %s1177_s23 = sphi %s1234_s23, %s1645_s23   ;;  %s1173_s22 = sphi %s1232_s22, %s1635_s22   ;;  %s1169_s21 = sphi %s1230_s21, %s1644_s21   ;;  %s1165_s20 = sphi %s1228_s20, %s1643_s20   ;;  %s1161_s19 = sphi %s1226_s19, %s1642_s19   ;;  %s1157_s18 = sphi %s1224_s18, %s1641_s18   ;;  %s1153_s17 = sphi %s1222_s17, %s1640_s17   ;;  %s1149_s16 = sphi %s1220_s16, %s1639_s16   ;;  %s1145_s15 = sphi %s1218_s15, %s1638_s15  }
  0x10   : > { %1615 = sst [smem:[#allocation16_spill]] %s1181_s24  ;;  %s753_s27 = sadd.s32 4294967294, %s1185_s25  }
  0x11   : > { %p53_p0 = scmp.ne.s32.totalorder %s1161_s19, %s1157_s18  ;;  %p1274_p1 = scmp.eq.s32.totalorder %s752_s26, 0 }
  0x12   : > { %p141_p2 = scmp.ne.s32.totalorder %s1153_s17, %s1149_s16  ;;  %p142_p3 = scmp.eq.s32.totalorder %s752_s26, 7 }
  0x13   : > { %p1282_p4 = por %p1274_p1, %p53_p0  ;;  %p147_p5 = scmp.ne.s32.totalorder %s1149_s16, %s1145_s15 }
  0x14   : > { %p1288_p6 = por %p142_p3, %p141_p2  ;;  %p148_p7 = scmp.eq.s32.totalorder %s753_s27, 7 }
  0x15   : > { %p754_p8 = scmp.ge.s32.totalorder %s1185_s25, 1  ;;  %p155_p9 = scmp.lt.s32.totalorder %s1185_s25, 9 }
  0x16   : > { %s1618_s30 = scalar_select %p1288_p6, 1, 0 }
  0x17   : > { %p1294_p10 = por %p148_p7, %p147_p5  ;;  %p1298_p11 = pnand %p754_p8, %p155_p9 }
  0x18   : > { %1619 = sst [smem:[#allocation17_spill]] %s1618_s30  ;;  %s1187_s10 = smov [#allocation9]  }
  0x19   : > { %s1620_s5 = scalar_select %p1294_p10, 1, 0 }
  0x1a   : > { %s1623_s1 = sld [smem:[#allocation21_spill]]  ;;  %p885_p12 = pneg %p1298_p11 }
  0x1b   : > { %1621 = sst [smem:[#allocation18_spill]] %s1620_s5  ;;  %s168_s11 = sshll.u32 %s1187_s10, 4  ;;  %s169_s11 = int_to_ptr.vmem [resolvable:$true] %s168_s11 }
  0x1c   : > { %p886_p13 = pnand %p885_p12, %p1274_p1  ;;  %s1600_s12 = smov 64  }
  0x1d   : > { %s1601_s13 = smov 4   ;;  %s30_s14 = sadd.s32 1, %s1177_s23 }
  0x1e   : > { %p31_p0 = scmp.ge.s32.totalorder %s30_s14, 4  ;;  %s33_s18 = sadd.s32 1, %s1181_s24 }
  0x1f   : > { %p47_p2 = scmp.ne.s32.totalorder %s1165_s20, %s1161_s19  ;;  %p48_p3 = scmp.eq.s32.totalorder %s1185_s25, 0 }
  0x20   : > { %s166_s9 = sshll.u32 %s1623_s1, 4  ;;  %s1647_s14 = smov (%p31_p0, %s30_s14), 0  ;;  %s167_s9 = int_to_ptr.hbm [resolvable:$true] %s166_s9 }
  0x21   : > { %888 = dma.hbm_to_vmem [thread:$0]  (!%p886_p13), %s167_s9, 1024, %s169_s11, [#allocation10], %s1600_s12, %s1600_s12, %s1601_s13  }
  0x22   : > { %1624 = sst [smem:[#allocation19_spill]] %s1647_s14  ;;  %s1649_s18 = smov (!%p31_p0, %s33_s18), %s1181_s24 }
  0x23   : > { %s37_s26 = ssub.s32 %s1177_s23, %s1647_s14  ;;  %s40_s27 = sadd.s32 1, %s1165_s20 }
  0x24   : > { %p35_p5 = scmp.ge.s32.totalorder %s1649_s18, 2  ;;  %p38_p7 = scmp.eq.s32.totalorder %s37_s26, 0 }
  0x25   : > { %p1323_p8 = por %p48_p3, %p47_p2  ;;  %s126_s8 = smul.u32 %s1177_s23, %s1181_s24 }
  0x26   : > { %s1651_s18 = smov (%p35_p5, %s1649_s18), 0  ;;  %s131_s11 = sadd.s32 1, %s1153_s17 }
  0x27   : > { %1626 = sst [smem:[#allocation20_spill]] %s1651_s18  ;;  %s127_s10 = smul.u32 %s1651_s18, %s1647_s14 }
  0x28   : > { %s1332_s9 = scalar_select %p38_p7, %s1165_s20, %s40_s27  }
  0x29   : > { %s188_s12 = sand.u32 1, %s1165_s20   ;;  %s835_s13 = sshll.u32 %s1177_s23, 6 }
  0x2a   : > { %s128_s1 = ssub.s32 %s126_s8, %s127_s10  ;;  %p898_p9 = scmp.lt.s32.totalorder %s1185_s25, 8 }
  0x2b   : > { %p129_p12 = scmp.eq.s32.totalorder %s128_s1, 0  ;;  %s757_s5 = sshll.u32 %s188_s12, 6 }
  0x2c   : > { %s197_s4 = scalar_lea.hbm %s1595_s0, %s835_s13  ;;  %s192_s3 = scalar_lea.vmem [#allocation6], %s757_s5 }
  0x2d   : > { %s1344_s30 = scalar_select %p129_p12, %s1153_s17, %s131_s11  }
  0x2e   : > { %s198_s24 = sshll.u32 %s197_s4, 4  ;;  %s200_s2 = sshll.u32 %s192_s3, 4  ;;  %s199_s24 = int_to_ptr.hbm [resolvable:$true] %s198_s24  ;;  %s201_s2 = int_to_ptr.vmem [resolvable:$true] %s200_s2 }
  0x2f   : > { %p890_p13 = pnand %p898_p9, %p1323_p8  ;;  %s189_s27 = scalar_lea.sflag [#allocation7], %s188_s12 }
  0x30   : > { %s1627_s18 = smov 4   ;;  %s1628_s14 = smov 64  }
  0x31   : > { %892 = dma.hbm_to_vmem [thread:$0]  (!%p890_p13), %s199_s24, 1024, %s201_s2, %s189_s27, %s1628_s14, %s1628_s14, %s1627_s18  }
  0x32   : > { %212 = sbr.rel (%p1298_p11) target bundleno = 408 (0x198), region = 36  ;;  %s214_s1 = sand.u32 (!%p1298_p11), 1, %s1161_s19  }
  0x33   : > { %s761_s15 = sshll.u32 (!%p1298_p11), %s214_s1, 6  ;;  %s215_s13 = scalar_lea.sflag (!%p1298_p11), [#allocation7], %s214_s1 }
  0x34   : > { %s1354_s4 = scalar_lea.vmem (!%p1298_p11), [#allocation6], %s761_s15 }
  0x37   : > { %1132 = dma.done.wait (%p1282_p4), %s215_s13, 1024  }
  0x38   : > { %1134 = vsyncadd (%p1282_p4), %s215_s13, 4294966272 }
  0x39   : > { %1136 = dma.done.wait (%p1274_p1), [#allocation10], 1024  }
  0x3a   : > { %1138 = vsyncadd (%p1274_p1), [#allocation10], 4294966272  ;;  %s246_s2 = sand.u32 1, %s1149_s16   ;;  %p252_p11 = scmp.eq.s32.totalorder %s1173_s22, 0 }
  0x3b   : > { %s763_s3 = sshll.u32 %s246_s2, 7  ;;  %p253_p0 = scmp.eq.s32.totalorder %s1169_s21, 0 }
  0x3c   : > { %s1371_s24 = scalar_lea.vmem [#allocation11], %s763_s3 }
  0x3d   : > { %p254_p2 = pnand %p253_p0, %p252_p11 }
  0x3f   : > { %257 = sbr.rel (%p254_p2) target bundleno = 71 (0x47), region = 48 }
  0x44   : > { %v1190_v0 = vmov 0.0  }
  0x45   : > { %258 = vst [vmem:[#allocation2] sm:$0x1] %v1190_v0 }
  0x46   : > { %259 = vst [vmem:[#allocation3] sm:$0x1] %v1190_v0 }
  0x47 PF: > { %v851_v1 = vld [vmem:[#allocation9 + $0x38] sm:$0xff]  ;;  %v850_v2 = vld [vmem:[#allocation9 + $0x30] sm:$0xff]  ;;  %v849_v3 = vld [vmem:[#allocation9 + $0x28] sm:$0xff]  ;;  %p828_p1 = scmp.ne.s32.totalorder %s1173_s22, 0 }
  0x48   : > { %388 = vmatpush.bf16.msra.mxu0 %v851_v1  ;;  %853 = vmatpush.bf16.msra.mxu1 %v851_v1  ;;  %v848_v4 = vld [vmem:[#allocation9 + $0x20] sm:$0xff]  ;;  %v847_v5 = vld [vmem:[#allocation9 + $0x18] sm:$0xff]  ;;  %v846_v6 = vld [vmem:[#allocation9 + $0x10] sm:$0xff] }
  0x49   : > { %854 = vmatpush.bf16.msra.mxu2 %v851_v1  ;;  %855 = vmatpush.bf16.msra.mxu3 %v851_v1  ;;  %v845_v7 = vld [vmem:[#allocation9 + $0x8] sm:$0xff]  ;;  %v844_v8 = vld [vmem:[#allocation9] sm:$0xff]  ;;  %v838_v10 = vld [vmem:[%s1354_s4 + $0x10] sm:$0xff] }
  0x4a   : > { %v836_v9 = vld [vmem:[%s1354_s4] sm:$0xff]  ;;  %v842_v12 = vld [vmem:[%s1354_s4 + $0x30] sm:$0xff]  ;;  %v837_v13 = vld [vmem:[%s1354_s4 + $0x8] sm:$0xff] }
  0x4b   : > { %v840_v11 = vld [vmem:[%s1354_s4 + $0x20] sm:$0xff]  ;;  %v839_v14 = vld [vmem:[%s1354_s4 + $0x18] sm:$0xff]  ;;  %v841_v15 = vld [vmem:[%s1354_s4 + $0x28] sm:$0xff] }
  0x4c   : > { %389 = vmatpush.bf16.msra.mxu0 %v850_v2  ;;  %856 = vmatpush.bf16.msra.mxu1 %v850_v2  ;;  %v843_v16 = vld [vmem:[%s1354_s4 + $0x38] sm:$0xff] }
  0x4d   : > { %857 = vmatpush.bf16.msra.mxu2 %v850_v2  ;;  %858 = vmatpush.bf16.msra.mxu3 %v850_v2 }
  0x50   : > { %390 = vmatpush.bf16.msra.mxu0 %v849_v3  ;;  %859 = vmatpush.bf16.msra.mxu1 %v849_v3 }
  0x51   : > { %860 = vmatpush.bf16.msra.mxu2 %v849_v3  ;;  %861 = vmatpush.bf16.msra.mxu3 %v849_v3 }
  0x54   : > { %391 = vmatpush.bf16.msra.mxu0 %v848_v4  ;;  %862 = vmatpush.bf16.msra.mxu1 %v848_v4 }
  0x55   : > { %863 = vmatpush.bf16.msra.mxu2 %v848_v4  ;;  %864 = vmatpush.bf16.msra.mxu3 %v848_v4 }
  0x58   : > { %392 = vmatpush.bf16.msra.mxu0 %v847_v5  ;;  %865 = vmatpush.bf16.msra.mxu1 %v847_v5 }
  0x59   : > { %866 = vmatpush.bf16.msra.mxu2 %v847_v5  ;;  %867 = vmatpush.bf16.msra.mxu3 %v847_v5 }
  0x5c   : > { %393 = vmatpush.bf16.msra.mxu0 %v846_v6  ;;  %868 = vmatpush.bf16.msra.mxu1 %v846_v6 }
  0x5d   : > { %869 = vmatpush.bf16.msra.mxu2 %v846_v6  ;;  %870 = vmatpush.bf16.msra.mxu3 %v846_v6 }
  0x60   : > { %394 = vmatpush.bf16.msra.mxu0 %v845_v7  ;;  %871 = vmatpush.bf16.msra.mxu1 %v845_v7 }
  0x61   : > { %872 = vmatpush.bf16.msra.mxu2 %v845_v7  ;;  %873 = vmatpush.bf16.msra.mxu3 %v845_v7 }
  0x64   : > { %395 = vmatpush.bf16.msra.mxu0 %v844_v8  ;;  %874 = vmatpush.bf16.msra.mxu1 %v844_v8 }
  0x65   : > { %875 = vmatpush.bf16.msra.mxu2 %v844_v8  ;;  %876 = vmatpush.bf16.msra.mxu3 %v844_v8 }
  0x67   : > { %396 = vmatmul.bf16.vlgmr.msra.gmra.mxu0 %v836_v9  ;;  %406 = vmatmul.bf16.vlgmr.msra.gmra.mxu1 %v838_v10 }
  0x68   : > { %416 = vmatmul.bf16.vlgmr.msra.gmra.mxu2 %v840_v11  ;;  %426 = vmatmul.bf16.vlgmr.msra.gmra.mxu3 %v842_v12 }
  0x77   : > { %401 = vmatmul.bf16.gmra.mxu0 %v837_v13  ;;  %411 = vmatmul.bf16.gmra.mxu1 %v839_v14 }
  0x78   : > { %421 = vmatmul.bf16.gmra.mxu2 %v841_v15  ;;  %431 = vmatmul.bf16.gmra.mxu3 %v843_v16 }
  0xe4   : > { %v1381_v17 = vpop.f32.mrf.mxu0  ;;  %v1383_v18 = vpop.f32.mrf.mxu1 }
  0xeb   : > { %v1385_v19 = vpop.f32.mrf.mxu2  ;;  %v1387_v20 = vpop.f32.mrf.mxu3 }
  0xec   : > { %v1389_v21 = vpop.f32.mrf.mxu0  ;;  %v1391_v22 = vpop.f32.mrf.mxu1 }
  0xf3   : > { %v1393_v23 = vpop.f32.mrf.mxu2  ;;  %v1395_v24 = vpop.f32.mrf.mxu3 }
  0xf4   : > { %v1397_v25 = vpop.f32.mrf.mxu0  ;;  %v1399_v26 = vpop.f32.mrf.mxu1 }
  0xfb   : > { %v1401_v27 = vpop.f32.mrf.mxu2  ;;  %v1403_v28 = vpop.f32.mrf.mxu3 }
  0xfc   : > { %v1405_v29 = vpop.f32.mrf.mxu0  ;;  %v1407_v30 = vpop.f32.mrf.mxu1 }
  0xff   : > { %439 = sbr.rel (%p828_p1) target bundleno = 307 (0x133), region = 52 }
 0x103   : > { %v1409_v31 = vpop.f32.mrf.mxu2  ;;  %v1411_v32 = vpop.f32.mrf.mxu3 }
 0x104   : > { %v441_v33 = vadd.f32 %v1389_v21, %v1381_v17  ;;  %v465_v34 = vmul.f32 %v1381_v17, %v1381_v17  ;;  %v466_v35 = vmul.f32 %v1389_v21, %v1389_v21  ;;  %v467_v37 = vmul.f32 %v1397_v25, %v1397_v25 }
 0x105   : > { %v468_v39 = vmul.f32 %v1405_v29, %v1405_v29  ;;  %v469_v42 = vmul.f32 %v1383_v18, %v1383_v18  ;;  %v470_v45 = vmul.f32 %v1391_v22, %v1391_v22  ;;  %v471_v48 = vmul.f32 %v1399_v26, %v1399_v26 }
 0x106   : > { %v442_v36 = vadd.f32 %v441_v33, %v1397_v25  ;;  %v481_v40 = vadd.f32 %v466_v35, %v465_v34  ;;  %v472_v51 = vmul.f32 %v1407_v30, %v1407_v30  ;;  %v473_v54 = vmul.f32 %v1385_v19, %v1385_v19 }
 0x107   : > { %v474_v57 = vmul.f32 %v1393_v23, %v1393_v23  ;;  %v475_v60 = vmul.f32 %v1401_v27, %v1401_v27  ;;  %v476_v63 = vmul.f32 %v1409_v31, %v1409_v31  ;;  %v477_v2 = vmul.f32 %v1387_v20, %v1387_v20 }
 0x108   : > { %v443_v38 = vadd.f32 %v442_v36, %v1405_v29  ;;  %v482_v43 = vadd.f32 %v481_v40, %v467_v37  ;;  %v478_v5 = vmul.f32 %v1395_v24, %v1395_v24  ;;  %v479_v8 = vmul.f32 %v1403_v28, %v1403_v28 }
 0x109   : > { %v480_v11 = vmul.f32 %v1411_v32, %v1411_v32 }
 0x10a   : > { %v444_v41 = vadd.f32 %v443_v38, %v1383_v18  ;;  %v483_v46 = vadd.f32 %v482_v43, %v468_v39  ;;  %v440_v39 = vld [vmem:[#allocation2] sm:$0x1] }
 0x10c   : > { %v445_v44 = vadd.f32 %v444_v41, %v1391_v22  ;;  %v484_v49 = vadd.f32 %v483_v46, %v469_v42 }
 0x10e   : > { %v446_v47 = vadd.f32 %v445_v44, %v1399_v26  ;;  %v485_v52 = vadd.f32 %v484_v49, %v470_v45  ;;  %v464_v44 = vld [vmem:[#allocation3] sm:$0x1] }
 0x110   : > { %v447_v50 = vadd.f32 %v446_v47, %v1407_v30  ;;  %v486_v55 = vadd.f32 %v485_v52, %v471_v48 }
 0x112   : > { %v448_v53 = vadd.f32 %v447_v50, %v1385_v19  ;;  %v487_v58 = vadd.f32 %v486_v55, %v472_v51 }
 0x114   : > { %v449_v56 = vadd.f32 %v448_v53, %v1393_v23  ;;  %v488_v61 = vadd.f32 %v487_v58, %v473_v54 }
 0x116   : > { %v450_v59 = vadd.f32 %v449_v56, %v1401_v27  ;;  %v489_v0 = vadd.f32 %v488_v61, %v474_v57 }
 0x118   : > { %v451_v62 = vadd.f32 %v450_v59, %v1409_v31  ;;  %v490_v3 = vadd.f32 %v489_v0, %v475_v60 }
 0x11a   : > { %v452_v1 = vadd.f32 %v451_v62, %v1387_v20  ;;  %v491_v6 = vadd.f32 %v490_v3, %v476_v63 }
 0x11c   : > { %v453_v4 = vadd.f32 %v452_v1, %v1395_v24  ;;  %v492_v9 = vadd.f32 %v491_v6, %v477_v2 }
 0x11e   : > { %v454_v7 = vadd.f32 %v453_v4, %v1403_v28  ;;  %v493_v12 = vadd.f32 %v492_v9, %v478_v5 }
 0x120   : > { %v455_v10 = vadd.f32 %v454_v7, %v1411_v32  ;;  %v494_v14 = vadd.f32 %v493_v12, %v479_v8 }
 0x122   : > { %v456_v13 = vrot.slane %v455_v10, 4  ;;  %v495_v16 = vadd.f32 %v494_v14, %v480_v11 }
 0x124   : > { %v457_v15 = vadd.f32 %v456_v13, %v455_v10  ;;  %v496_v34 = vrot.slane %v495_v16, 4 }
 0x126   : > { %v458_v33 = vrot.slane %v457_v15, 2  ;;  %v497_v36 = vadd.f32 %v496_v34, %v495_v16 }
 0x128   : > { %v459_v35 = vadd.f32 %v458_v33, %v457_v15  ;;  %v498_v38 = vrot.slane %v497_v36, 2 }
 0x12a   : > { %v460_v37 = vrot.slane %v459_v35, 1  ;;  %v499_v41 = vadd.f32 %v498_v38, %v497_v36 }
 0x12c   : > { %v461_v40 = vadd.f32 %v460_v37, %v459_v35  ;;  %v500_v43 = vrot.slane %v499_v41, 1 }
 0x12e   : > { %v462_v42 = vadd.f32 %v461_v40, %v440_v39  ;;  %v501_v45 = vadd.f32 %v500_v43, %v499_v41 }
 0x130   : > { %463 = vst [vmem:[#allocation2] sm:$0x1] %v462_v42  ;;  %v502_v46 = vadd.f32 %v501_v45, %v464_v44 }
 0x132   : > { %503 = vst [vmem:[#allocation3] sm:$0x1] %v502_v46 }
 0x133 PF: > { %p504_p4 = scmp.eq.s32.totalorder %s1173_s22, 1 }
 0x135   : > { %p505_p3 = pnand %p504_p4, %p253_p0 }
 0x136   : > { %s1629_s5 = sld [smem:[#allocation22_spill]] (!%p505_p3) }
 0x137   : > { %508 = sbr.rel (%p505_p3) target bundleno = 352 (0x160), region = 56  ;;  %s1630_s14 = sld [smem:[#allocation23_spill]] (!%p505_p3) }
 0x13c   : > { %v509_v47 = vld [vmem:[#allocation2] sm:$0x1]  ;;  %v511_v48 = vld [vmem:[#allocation3] sm:$0x1] }
 0x13d   : > { %v510_v49 = vmul.f32 0.0025510204, %v509_v47  ;;  %v512_v50 = vmul.f32 0.0025510204, %v511_v48  ;;  %v516_v60 = vld [vmem:[%s1629_s5] sm:$0x1] }
 0x13e   : > { %v530_v0 = vld [vmem:[%s1630_s14] sm:$0x1] }
 0x13f   : > { %v513_v51 = vmul.f32 %v510_v49, %v510_v49 }
 0x141   : > { %v514_v52 = vsub.f32 %v512_v50, %v513_v51 }
 0x143   : > { %v515_v53 = vmax.f32 %v514_v52, 0.0 }
 0x145   : > { %v517_v54 = vadd.f32 1e-05, %v515_v53 }
 0x147   : > { %995 = vrsqrt.f32 %v517_v54  ;;  %vm524_vm0 = vweird.f32 %v517_v54 }
 0x14d   : > { %v996_v55 = vpop.eup %995 }
 0x14e   : > { %v519_v56 = vmul.f32 %v996_v55, %v517_v54  ;;  %vm525_vm1 = vweird.f32 %v996_v55 }
 0x14f   : > { %vm526_vm2 = vmor %vm524_vm0, %vm525_vm1 }
 0x150   : > { %v520_v57 = vmul.f32 %v996_v55, %v519_v56 }
 0x152   : > { %v521_v58 = vmul.f32 0.5, %v520_v57 }
 0x154   : > { %v522_v59 = vsub.f32 1.5, %v521_v58 }
 0x156   : > { %v523_v61 = vmul.f32 %v996_v55, %v522_v59 }
 0x158   : > { %v527_v62 = vsel %vm526_vm2, %v996_v55, %v523_v61 }
 0x159   : > { %v528_v63 = vmul.f32 %v527_v62, %v516_v60 }
 0x15b   : > { %529 = vst [vmem:[#allocation4] sm:$0x1] %v528_v63  ;;  %v531_v1 = vmul.f32 %v528_v63, %v510_v49 }
 0x15d   : > { %v532_v2 = vsub.f32 %v530_v0, %v531_v1 }
 0x15f   : > { %533 = vst [vmem:[#allocation5] sm:$0x1] %v532_v2 }
 0x160 PF: > { %p829_p5 = scmp.ne.s32.totalorder %s1173_s22, 1 }
 0x162   : > { %536 = sbr.rel (%p829_p5) target bundleno = 386 (0x182), region = 60 }
 0x167   : > { %v1472_v3 = vld [vmem:[#allocation4] ss:$0 sm:$0xff]  ;;  %v1474_v4 = vld [vmem:[#allocation5] ss:$0 sm:$0xff] }
 0x168   : > { %v541_v5 = vmul.f32 %v1472_v3, %v1381_v17  ;;  %v542_v6 = vmul.f32 %v1472_v3, %v1389_v21  ;;  %v543_v7 = vmul.f32 %v1472_v3, %v1397_v25  ;;  %v544_v8 = vmul.f32 %v1472_v3, %v1405_v29 }
 0x169   : > { %v545_v9 = vmul.f32 %v1472_v3, %v1383_v18  ;;  %v546_v10 = vmul.f32 %v1472_v3, %v1391_v22  ;;  %v547_v11 = vmul.f32 %v1472_v3, %v1399_v26  ;;  %v548_v17 = vmul.f32 %v1472_v3, %v1407_v30 }
 0x16a   : > { %v561_v21 = vadd.f32 %v1474_v4, %v541_v5  ;;  %v562_v12 = vadd.f32 %v1474_v4, %v542_v6  ;;  %v563_v25 = vadd.f32 %v1474_v4, %v543_v7  ;;  %v564_v29 = vadd.f32 %v1474_v4, %v544_v8 }
 0x16b   : > { %v565_v13 = vadd.f32 %v1474_v4, %v545_v9  ;;  %v566_v18 = vadd.f32 %v1474_v4, %v546_v10  ;;  %v567_v22 = vadd.f32 %v1474_v4, %v547_v11  ;;  %v568_v26 = vadd.f32 %v1474_v4, %v548_v17 }
 0x16c   : > { %vm577_vm3 = vcmp.gt.f32.partialorder %v561_v21, 0.0  ;;  %v593_v14 = vmul.f32 0.1, %v561_v21  ;;  %vm578_vm4 = vcmp.gt.f32.partialorder %v562_v12, 0.0  ;;  %v594_v30 = vmul.f32 0.1, %v562_v12 }
 0x16d   : > { %vm579_vm5 = vcmp.gt.f32.partialorder %v563_v25, 0.0  ;;  %v595_v15 = vmul.f32 0.1, %v563_v25  ;;  %vm580_vm6 = vcmp.gt.f32.partialorder %v564_v29, 0.0  ;;  %v596_v16 = vmul.f32 0.1, %v564_v29 }
 0x16e   : > { %v609_v33 = vsel %vm577_vm3, %v561_v21, %v593_v14  ;;  %v610_v34 = vsel %vm578_vm4, %v562_v12, %v594_v30  ;;  %vm581_vm7 = vcmp.gt.f32.partialorder %v565_v13, 0.0  ;;  %v597_v35 = vmul.f32 0.1, %v565_v13 }
 0x16f   : > { %625 = vst [vmem:[%s1371_s24] sm:$0xff] %v609_v33  ;;  %v611_v36 = vsel %vm579_vm5, %v563_v25, %v595_v15  ;;  %v612_v37 = vsel %vm580_vm6, %v564_v29, %v596_v16  ;;  %vm582_vm8 = vcmp.gt.f32.partialorder %v566_v18, 0.0  ;;  %v598_v38 = vmul.f32 0.1, %v566_v18 }
 0x170   : > { %626 = vst [vmem:[%s1371_s24 + $0x8] sm:$0xff] %v610_v34  ;;  %v613_v39 = vsel %vm581_vm7, %v565_v13, %v597_v35  ;;  %vm583_vm9 = vcmp.gt.f32.partialorder %v567_v22, 0.0  ;;  %v599_v40 = vmul.f32 0.1, %v567_v22  ;;  %vm584_vm10 = vcmp.gt.f32.partialorder %v568_v26, 0.0 }
 0x171   : > { %627 = vst [vmem:[%s1371_s24 + $0x10] sm:$0xff] %v611_v36  ;;  %v614_v41 = vsel %vm582_vm8, %v566_v18, %v598_v38  ;;  %v600_v42 = vmul.f32 0.1, %v568_v26  ;;  %v549_v43 = vmul.f32 %v1472_v3, %v1385_v19  ;;  %v550_v44 = vmul.f32 %v1472_v3, %v1393_v23 }
 0x172   : > { %628 = vst [vmem:[%s1371_s24 + $0x18] sm:$0xff] %v612_v37  ;;  %v615_v45 = vsel %vm583_vm9, %v567_v22, %v599_v40  ;;  %v551_v46 = vmul.f32 %v1472_v3, %v1401_v27  ;;  %v552_v47 = vmul.f32 %v1472_v3, %v1409_v31  ;;  %v553_v48 = vmul.f32 %v1472_v3, %v1387_v20 }
 0x173   : > { %629 = vst [vmem:[%s1371_s24 + $0x20] sm:$0xff] %v613_v39  ;;  %v616_v49 = vsel %vm584_vm10, %v568_v26, %v600_v42  ;;  %v569_v19 = vadd.f32 %v1474_v4, %v549_v43  ;;  %v570_v50 = vadd.f32 %v1474_v4, %v550_v44  ;;  %v554_v23 = vmul.f32 %v1472_v3, %v1395_v24 }
 0x174   : > { %630 = vst [vmem:[%s1371_s24 + $0x28] sm:$0xff] %v614_v41  ;;  %v571_v51 = vadd.f32 %v1474_v4, %v551_v46  ;;  %v572_v27 = vadd.f32 %v1474_v4, %v552_v47  ;;  %v573_v31 = vadd.f32 %v1474_v4, %v553_v48  ;;  %v555_v20 = vmul.f32 %v1472_v3, %v1403_v28 }
 0x175   : > { %631 = vst [vmem:[%s1371_s24 + $0x30] sm:$0xff] %v615_v45  ;;  %vm585_vm11 = vcmp.gt.f32.partialorder %v569_v19, 0.0  ;;  %v601_v52 = vmul.f32 0.1, %v569_v19  ;;  %vm586_vm12 = vcmp.gt.f32.partialorder %v570_v50, 0.0  ;;  %v574_v53 = vadd.f32 %v1474_v4, %v554_v23 }
 0x176   : > { %632 = vst [vmem:[%s1371_s24 + $0x38] sm:$0xff] %v616_v49  ;;  %v602_v24 = vmul.f32 0.1, %v570_v50  ;;  %vm587_vm13 = vcmp.gt.f32.partialorder %v571_v51, 0.0  ;;  %v603_v54 = vmul.f32 0.1, %v571_v51  ;;  %v575_v55 = vadd.f32 %v1474_v4, %v555_v20 }
 0x177   : > { %v617_v56 = vsel %vm585_vm11, %v569_v19, %v601_v52  ;;  %vm588_vm14 = vcmp.gt.f32.partialorder %v572_v27, 0.0  ;;  %v604_v57 = vmul.f32 0.1, %v572_v27  ;;  %vm589_vm15 = vcmp.gt.f32.partialorder %v573_v31, 0.0 }
 0x178   : > { %633 = vst [vmem:[%s1371_s24 + $0x40] sm:$0xff] %v617_v56  ;;  %v618_v28 = vsel %vm586_vm12, %v570_v50, %v602_v24  ;;  %v619_v58 = vsel %vm587_vm13, %v571_v51, %v603_v54  ;;  %v605_v59 = vmul.f32 0.1, %v573_v31  ;;  %vm590_vm0 = vcmp.gt.f32.partialorder %v574_v53, 0.0 }
 0x179   : > { %634 = vst [vmem:[%s1371_s24 + $0x48] sm:$0xff] %v618_v28  ;;  %v620_v60 = vsel %vm588_vm14, %v572_v27, %v604_v57  ;;  %v606_v61 = vmul.f32 0.1, %v574_v53  ;;  %vm591_vm1 = vcmp.gt.f32.partialorder %v575_v55, 0.0  ;;  %v607_v62 = vmul.f32 0.1, %v575_v55 }
 0x17a   : > { %635 = vst [vmem:[%s1371_s24 + $0x50] sm:$0xff] %v619_v58  ;;  %v621_v63 = vsel %vm589_vm15, %v573_v31, %v605_v59  ;;  %v556_v0 = vmul.f32 %v1472_v3, %v1411_v32 }
 0x17b   : > { %636 = vst [vmem:[%s1371_s24 + $0x58] sm:$0xff] %v620_v60  ;;  %v622_v1 = vsel %vm590_vm0, %v574_v53, %v606_v61  ;;  %v623_v2 = vsel %vm591_vm1, %v575_v55, %v607_v62 }
 0x17c   : > { %637 = vst [vmem:[%s1371_s24 + $0x60] sm:$0xff] %v621_v63  ;;  %v576_v5 = vadd.f32 %v1474_v4, %v556_v0 }
 0x17d   : > { %638 = vst [vmem:[%s1371_s24 + $0x68] sm:$0xff] %v622_v1 }
 0x17e   : > { %639 = vst [vmem:[%s1371_s24 + $0x70] sm:$0xff] %v623_v2  ;;  %vm592_vm2 = vcmp.gt.f32.partialorder %v576_v5, 0.0  ;;  %v608_v6 = vmul.f32 0.1, %v576_v5 }
 0x180   : > { %v624_v7 = vsel %vm592_vm2, %v576_v5, %v608_v6 }
 0x181   : > { %640 = vst [vmem:[%s1371_s24 + $0x78] sm:$0xff] %v624_v7 }
 0x182 PF: > { %s649_s7 = smul.u32 %s1169_s21, %s1173_s22  ;;  %s655_s8 = sshll.u32 %s1371_s24, 4  ;;  %s656_s8 = int_to_ptr.vmem [resolvable:$true] %s655_s8 }
 0x183   : > { %s1632_s27 = sld [smem:[#allocation24_spill]]  ;;  %s642_s13 = scalar_lea.sflag [#allocation8], %s246_s2 }
 0x184   : > { %s852_s10 = sshll.u32 %s649_s7, 7 }
 0x189   : > { %s654_s1 = scalar_lea.hbm %s1632_s27, %s852_s10  ;;  %s1079_s22 = scalar_lea.hbm %s1632_s27, 512 }
 0x18a   : > { %s657_s15 = sshll.u32 %s654_s1, 4  ;;  %s658_s15 = int_to_ptr.hbm [resolvable:$true] %s657_s15 }
 0x18b   : > { %s1073_s4 = sshra.s32 %s658_s15, 4  ;;  %s1074_s4 = int_to_ptr.hbm [resolvable:$true] %s1073_s4 }
 0x18c   : > { %s1075_s3 = scalar_lea.hbm %s1074_s4, 128  ;;  %p1080_p12 = scmp.lt.s32.totalorder %s1074_s4, %s1632_s27 }
 0x18d   : > { %p1076_p7 = scmp.ne.s32.totalorder %s1074_s4, %s1075_s3  ;;  %p1081_p13 = scmp.lt.s32.totalorder %s1079_s22, %s1075_s3 }
 0x18f   : > { %p1077_p8 = pnand %p1076_p7, %p1288_p6  ;;  %p1082_p11 = por %p1081_p13, %p1080_p12 }
 0x191   : > { %p1078_p9 = pneg %p1077_p8 }
 0x193   : > { %p1083_p0 = pnand %p1082_p11, %p1078_p9 }
 0x195   : > { %1086 = shalt.err (!%p1083_p0)
}
 0x196   : > { %s1191_s2 = smov 128   ;;  %s1192_s5 = smov 8  }
 0x197   : > { %883 = dma.vmem_to_hbm [thread:$0]  (%p1288_p6), %s656_s8, 2048, %s658_s15, %s642_s13, %s1191_s2, %s1191_s2, %s1192_s5  }
 0x198 PF: > { %s1633_s6 = sld [smem:[#allocation15_spill]]  ;;  %p900_p2 = scmp.ge.s32.totalorder %s1185_s25, 2 }
 0x19a   : > { %p894_p1 = pnand %p900_p2, %p1294_p10 }
 0x19c   : > { %p895_p4 = pneg %p894_p1 }
 0x19e   : > { %s672_s14 = sand.u32 1, %s1633_s6  }
 0x19f   : > { %s673_s7 = scalar_lea.sflag [#allocation8], %s672_s14 }
 0x1a0   : > { %1140 = dma.done.wait (%p895_p4), %s673_s7, 2048  }
 0x1a1   : > { %1142 = vsyncadd (%p895_p4), %s673_s7, 4294965248  ;;  %s21_s25 = sadd.s32 1, %s1185_s25   ;;  %s1635_s22 = sld [smem:[#allocation16_spill]] }
 0x1a2   : > { %p18_p3 = scmp.ge.s32.totalorder %s21_s25, 10   ;;  %s1636_s8 = sld [smem:[#allocation19_spill]] }
 0x1a3   : > { %s1637_s24 = sld [smem:[#allocation20_spill]]  ;;  %s1638_s15 = smov %s1149_s16 }
 0x1a4   : > { %s1639_s16 = smov %s1153_s17  ;;  %s1640_s17 = smov %s1344_s30 }
 0x1a5   : > { %s1641_s18 = smov %s1161_s19  ;;  %s1642_s19 = smov %s1165_s20 }
 0x1a6   : > { %s1643_s20 = smov %s1332_s9  ;;  %s1644_s21 = smov %s1177_s23 }
 0x1a7   :  { %20 = sbr.rel (!%p18_p3) target bundleno = 15 (0xf), region = 101 }
 0x1a8   : > { %s1645_s23 = smov %s1636_s8 }
 0x1ac   :  { %679 = vsyncpa [#allocation7], 1 }
 0x1ad   :  { %681 = vsyncpa [#allocation7 + $0x1], 1 }
 0x1ae   :  { %682 = vsyncpa [#allocation10], 1 }
 0x1af   :  { %683 = vsyncpa [#allocation8], 1 }
 0x1b0   :  { %685 = vsyncpa [#allocation8 + $0x1], 1 }

</bundles_post_ra>
